<compile_context>
chip_gen: v7x
topology: tpu7x:2x2x1
jax: 0.10.0
libtpu: 0.0.40
codegen_flags: <defaults>
</compile_context>

<pallas_src>
import functools

import jax
import jax.numpy as jnp
from jax.experimental import pallas as pl
from jax.experimental.pallas import tpu as pltpu


# --------------------------------------------------------------------------
# Hardware detection helpers
# --------------------------------------------------------------------------
def _vmem_capacity_bytes():
    default = 64 * 1024 * 1024  # conservative (v7x per-TC VMEM)
    try:
        info = pltpu.get_tpu_info()
        cap = int(getattr(info, "vmem_capacity_bytes", default))
        if cap <= 0:
            cap = default
        return cap
    except Exception:
        return default


def _pick_bt(B, cap):
    """Largest divisor of B that is <= cap, preferring multiples of 8."""
    cap = max(1, min(int(cap), B))
    divs = [d for d in range(1, cap + 1) if B % d == 0]
    best = max(divs)
    divs8 = [d for d in divs if d % 8 == 0]
    if divs8 and 2 * max(divs8) >= best:   # 8-aligned unless it costs >2x
        return max(divs8)
    return best


# --------------------------------------------------------------------------
# Fused single-pass kernel (squeeze + excitation + scale; 1 read + 1 write of x)
# --------------------------------------------------------------------------
def _make_fused_kernel(inv_hw):
    """inv_hw = 1 / (H*W); static Python float."""

    def _se_kernel(x_ref, w1_ref, w2_ref, o_ref):
        # x_ref : (Bt, C, HW)   w1_ref: (C, C//r)   w2_ref: (C//r, C)
        x = x_ref[...]

        # ---- squeeze: f32 accumulation, no full f32 copy of the block ----
        y = jnp.sum(x, axis=-1, dtype=jnp.float32) * inv_hw          # (Bt, C)

        # ---- excitation: FC -> ReLU -> FC -> sigmoid (f32) ----
        h = jnp.dot(y, w1_ref[...].astype(jnp.float32),
                    preferred_element_type=jnp.float32)
        h = jnp.maximum(h, 0.0)                                      # (Bt, C//r)
        s = jnp.dot(h, w2_ref[...].astype(jnp.float32),
                    preferred_element_type=jnp.float32)
        s = jax.nn.sigmoid(s)                                        # (Bt, C)

        # ---- scale: broadcast gate over spatial, multiply in input dtype ----
        o_ref[...] = (x * s.astype(x.dtype)[:, :, None]).astype(o_ref.dtype)

    return _se_kernel


# --------------------------------------------------------------------------
# Fallback: HW-tiled two-pass pipeline (for slabs too big for one block)
# --------------------------------------------------------------------------
def _make_reduce_kernel(hw, thw, needs_mask):
    def _reduce_kernel(x_ref, sums_ref):
        # x_ref: (B, C, thw), sums_ref: (B, C) f32 (resident accumulator)
        j = pl.program_id(0)

        @pl.when(j == 0)
        def _():
            sums_ref[...] = jnp.zeros_like(sums_ref)

        x = x_ref[...]
        if needs_mask:
            valid = hw - j * thw   # lanes valid in this tile (>= thw except last)
            lane = jax.lax.broadcasted_iota(jnp.int32, x.shape, 2)
            x = jnp.where(lane < valid, x, jnp.zeros_like(x))
        sums_ref[...] += jnp.sum(x, axis=-1, dtype=jnp.float32)

    return _reduce_kernel


def _scale_kernel(x_ref, s_ref, o_ref):
    # x_ref/o_ref: (B, C, thw); s_ref: (B, C) f32 gate
    x = x_ref[...]
    o_ref[...] = (x * s_ref[...].astype(x.dtype)[:, :, None]).astype(o_ref.dtype)


def _se_fallback(x3, w1_t, w2_t, thw, vmem_limit):
    B, C, HW = x3.shape
    n_hw = pl.cdiv(HW, thw)
    itemsize = jnp.dtype(x3.dtype).itemsize

    # --- pass 1: per-channel spatial sums (f32), HW tiled ---
    sums = pl.pallas_call(
        _make_reduce_kernel(HW, thw, HW % thw != 0),
        out_shape=jax.ShapeDtypeStruct((B, C), jnp.float32),
        grid_spec=pltpu.PrefetchScalarGridSpec(
            num_scalar_prefetch=0,
            grid=(n_hw,),
            in_specs=[pl.BlockSpec((B, C, thw), lambda j: (0, 0, j))],
            out_specs=pl.BlockSpec((B, C), lambda j: (0, 0)),
        ),
        compiler_params=pltpu.CompilerParams(
            dimension_semantics=("arbitrary",),   # reduction axis (resident out)
            vmem_limit_bytes=vmem_limit,
        ),
        cost_estimate=pl.CostEstimate(
            flops=B * C * HW,
            transcendentals=0,
            bytes_accessed=B * C * HW * itemsize + B * C * 4,
        ),
    )(x3)

    # --- tiny excitation MLP on (B, C): cheaper as plain XLA than a kernel ---
    y = sums * (1.0 / float(HW))
    h = jnp.maximum(jnp.dot(y, w1_t.astype(jnp.float32)), 0.0)
    s = jax.nn.sigmoid(jnp.dot(h, w2_t.astype(jnp.float32)))        # (B, C) f32

    # --- pass 2: apply gate per HW tile (fully parallel; both TCs on v7x) ---
    out3 = pl.pallas_call(
        _scale_kernel,
        out_shape=jax.ShapeDtypeStruct((B, C, HW), x3.dtype),
        grid_spec=pltpu.PrefetchScalarGridSpec(
            num_scalar_prefetch=0,
            grid=(n_hw,),
            in_specs=[pl.BlockSpec((B, C, thw), lambda j: (0, 0, j)),
                      pl.BlockSpec((B, C), lambda j: (0, 0))],
            out_specs=pl.BlockSpec((B, C, thw), lambda j: (0, 0, j)),
        ),
        compiler_params=pltpu.CompilerParams(
            dimension_semantics=("parallel",),
            vmem_limit_bytes=vmem_limit,
        ),
        cost_estimate=pl.CostEstimate(
            flops=B * C * HW,
            transcendentals=0,
            bytes_accessed=2 * B * C * HW * itemsize,
        ),
    )(x3, s)
    return out3


# --------------------------------------------------------------------------
# Public wrapper
# --------------------------------------------------------------------------
@functools.partial(jax.jit, static_argnames=("force_fallback",))
def se_layer(x_nchw, w1_t, w2_t, force_fallback=False):
    """x_nchw: (B, C, H, W); w1_t: (C, C//r); w2_t: (C//r, C)."""
    B, C, H, W = x_nchw.shape
    HW = H * W
    hid = w1_t.shape[1]
    itemsize = jnp.dtype(x_nchw.dtype).itemsize

    x3 = x_nchw.reshape(B, C, HW)        # contiguous -> free (no HBM copy)

    # ---- generation-aware VMEM budget ----
    vmem_cap = _vmem_capacity_bytes()
    two_tc = vmem_cap <= 64 * 1024 * 1024          # v7x heuristic (2 TCs)
    vmem_limit = max(vmem_cap - 16 * 1024 * 1024, 32 * 1024 * 1024)
    vmem_budget = int(vmem_limit * 0.8)
    per_block_budget = vmem_budget // 4            # double-buffered in + out

    bytes_per_sample = C * HW * itemsize
    use_fallback = (force_fallback or bytes_per_sample > per_block_budget) and HW > 128

    if use_fallback:
        # HW-tiled two-pass path for feature maps too large for one block.
        thw = max(128, (per_block_budget // max(1, B * C * itemsize)) // 128 * 128)
        thw = min(thw, max(128, (HW // 128) * 128))
        out3 = _se_fallback(x3, w1_t, w2_t, thw, vmem_limit)
        return out3.reshape(B, C, H, W)

    # ---- fused single-pass path ----
    cap = max(1, per_block_budget // bytes_per_sample)
    if two_tc and B > 1:
        # Keep grid >= 2 only where there are 2 TensorCores to shard onto.
        cap = min(cap, max(1, B // 2))
    Bt = _pick_bt(B, cap)          # divisor of B -> no batch pad
    n_blocks = B // Bt
    # NOTE: B == 1 on a 2-TC chip runs on one core here; the two-pass fallback
    # could split HW across cores but costs an extra read of x, so we keep the
    # single fused pass.

    kernel = _make_fused_kernel(1.0 / float(HW))

    out3 = pl.pallas_call(
        kernel,
        out_shape=jax.ShapeDtypeStruct((B, C, HW), x_nchw.dtype),
        grid_spec=pltpu.PrefetchScalarGridSpec(
            num_scalar_prefetch=0,
            grid=(n_blocks,),
            in_specs=[
                pl.BlockSpec((Bt, C, HW), lambda b: (b, 0, 0)),
                pl.BlockSpec((C, hid), lambda b: (0, 0)),   # resident weights
                pl.BlockSpec((hid, C), lambda b: (0, 0)),
            ],
            out_specs=pl.BlockSpec((Bt, C, HW), lambda b: (b, 0, 0)),
        ),
        compiler_params=pltpu.CompilerParams(
            dimension_semantics=("parallel",),
            vmem_limit_bytes=vmem_limit,
        ),
        cost_estimate=pl.CostEstimate(
            flops=2 * B * C * HW + 4 * B * C * hid,
            transcendentals=B * C,
            bytes_accessed=2 * B * C * HW * itemsize + 2 * C * hid * 4,
        ),
    )(x3, w1_t, w2_t)

    return out3.reshape(B, C, H, W)


# --------------------------------------------------------------------------
# Reference + test
# --------------------------------------------------------------------------
def _reference(x, w1_t, w2_t):
    xf = x.astype(jnp.float32)
    y = jnp.mean(xf, axis=(2, 3))                       # (B, C)
    h = jnp.maximum(y @ w1_t.astype(jnp.float32), 0.0)
    s = jax.nn.sigmoid(h @ w2_t.astype(jnp.float32))
    return (xf * s[:, :, None, None]).astype(x.dtype)


if __name__ == "__main__":
    # Module: SELayer(channel=64, reduction=8) -> hidden = 8
    B, C, H, W = 2, 64, 16, 16
    reduction = 8
    hid = C // reduction

    key = jax.random.PRNGKey(0)
    kx, k1, k2 = jax.random.split(key, 3)

    x = jax.random.normal(kx, (B, C, H, W), dtype=jnp.float32)
    # nn.Linear weights are (out, in); store transposed so kernel does y @ W^T.
    w1 = jax.random.normal(k1, (hid, C), dtype=jnp.float32) * 0.1   # Linear(C, C//r)
    w2 = jax.random.normal(k2, (C, hid), dtype=jnp.float32) * 0.1   # Linear(C//r, C)
    w1_t = w1.T          # (C, hid)
    w2_t = w2.T          # (hid, C)

    # 1) fused path, f32
    out = jax.block_until_ready(se_layer(x, w1_t, w2_t))
    ref = _reference(x, w1_t, w2_t)
    assert out.shape == (B, C, H, W)
    assert jnp.allclose(out, ref, atol=1e-5, rtol=1e-5), "f32 mismatch vs reference"

    # 2) fused path, bf16 input (gate rounded to bf16 in-kernel -> loose tol)
    xb = x.astype(jnp.bfloat16)
    outb = jax.block_until_ready(se_layer(xb, w1_t, w2_t))
    refb = _reference(xb, w1_t, w2_t)
    assert jnp.allclose(outb.astype(jnp.float32), refb.astype(jnp.float32),
                        atol=5e-2, rtol=5e-2), "bf16 mismatch vs reference"

    # 3) forced HW-tiled fallback path (ragged last tile: 12*12 = 144 lanes)
    x2 = jax.random.normal(kx, (1, C, 12, 12), dtype=jnp.float32)
    out2 = jax.block_until_ready(se_layer(x2, w1_t, w2_t, force_fallback=True))
    ref2 = _reference(x2, w1_t, w2_t)
    assert jnp.allclose(out2, ref2, atol=1e-5, rtol=1e-5), "fallback mismatch vs reference"

    print("KERNEL_OK")
</pallas_src>

<mosaic_0001>
module attributes {stable_mosaic.version = 11 : i64} {
  func.func @_se_kernel(%arg0: i32, %arg1: memref<1x64x256xf32, #tpu.memory_space<vmem>>, %arg2: memref<64x8xf32, #tpu.memory_space<vmem>>, %arg3: memref<8x64xf32, #tpu.memory_space<vmem>>, %arg4: memref<1x64x256xf32, #tpu.memory_space<vmem>>) attributes {dimension_semantics = [#tpu.dimension_semantics<parallel>], iteration_bounds = array<i64: 2>, scalar_prefetch = 0 : i64, scratch_operands = 0 : i64, tpu.core_type = #tpu.core_type<tc>, window_params = [{transform_indices = @transform_0, window_bounds = array<i64: 1, 64, 256>}, {pipeline_mode = #tpu.pipeline_mode<synchronous>, transform_indices = @transform_1, window_bounds = array<i64: 64, 8>}, {pipeline_mode = #tpu.pipeline_mode<synchronous>, transform_indices = @transform_2, window_bounds = array<i64: 8, 64>}, {transform_indices = @transform_3, window_bounds = array<i64: 1, 64, 256>}]} {
    %c0 = arith.constant 0 : index
    %c0_0 = arith.constant 0 : index
    %c0_1 = arith.constant 0 : index
    %0 = vector.load %arg1[%c0, %c0_0, %c0_1] : memref<1x64x256xf32, #tpu.memory_space<vmem>>, vector<1x64x256xf32>
    %cst = arith.constant dense<0.000000e+00> : vector<1x64xf32>
    %1 = vector.multi_reduction <add>, %0, %cst [2] : vector<1x64x256xf32> to vector<1x64xf32>
    %cst_2 = arith.constant 3.906250e-03 : f32
    %2 = vector.broadcast %cst_2 : f32 to vector<1x64xf32>
    %3 = arith.mulf %1, %2 : vector<1x64xf32>
    %c0_3 = arith.constant 0 : index
    %c0_4 = arith.constant 0 : index
    %4 = vector.load %arg2[%c0_3, %c0_4] : memref<64x8xf32, #tpu.memory_space<vmem>>, vector<64x8xf32>
    %cst_5 = arith.constant dense<0.000000e+00> : vector<1x8xf32>
    %5 = tpu.matmul %3, %4, %cst_5 {dimension_numbers = #tpu.dot_dimension_numbers<[1], [0], [0], [1], [0, 0, 1, 1], [], []>} : vector<1x64xf32>, vector<64x8xf32>, vector<1x8xf32> -> vector<1x8xf32>
    %cst_6 = arith.constant 0.000000e+00 : f32
    %6 = vector.broadcast %cst_6 : f32 to vector<1x8xf32>
    %7 = arith.maximumf %5, %6 : vector<1x8xf32>
    %c0_7 = arith.constant 0 : index
    %c0_8 = arith.constant 0 : index
    %8 = vector.load %arg3[%c0_7, %c0_8] : memref<8x64xf32, #tpu.memory_space<vmem>>, vector<8x64xf32>
    %cst_9 = arith.constant dense<0.000000e+00> : vector<1x64xf32>
    %9 = tpu.matmul %7, %8, %cst_9 {dimension_numbers = #tpu.dot_dimension_numbers<[1], [0], [0], [1], [0, 0, 1, 1], [], []>} : vector<1x8xf32>, vector<8x64xf32>, vector<1x64xf32> -> vector<1x64xf32>
    %10 = arith.negf %9 : vector<1x64xf32>
    %11 = math.exp %10 : vector<1x64xf32>
    %cst_10 = arith.constant 1.000000e+00 : f32
    %12 = vector.broadcast %cst_10 : f32 to vector<1x64xf32>
    %13 = arith.addf %12, %11 : vector<1x64xf32>
    %14 = arith.divf %12, %13 : vector<1x64xf32>
    %15 = vector.shape_cast %14 : vector<1x64xf32> to vector<1x64x1xf32>
    %16 = vector.broadcast %15 : vector<1x64x1xf32> to vector<1x64x256xf32>
    %17 = arith.mulf %0, %16 : vector<1x64x256xf32>
    %c0_11 = arith.constant 0 : index
    %c0_12 = arith.constant 0 : index
    %c0_13 = arith.constant 0 : index
    %18 = vector.load %arg4[%c0_11, %c0_12, %c0_13] : memref<1x64x256xf32, #tpu.memory_space<vmem>>, vector<1x64x256xf32>
    tpu.vector_store %arg4[%c0_11, %c0_12, %c0_13], %17 {strides = array<i32>} : memref<1x64x256xf32, #tpu.memory_space<vmem>>, vector<1x64x256xf32>,
    return
  }
  func.func @transform_0(%arg0: i32) -> (i32, i32, i32) {
    %c0_i32 = arith.constant 0 : i32
    %c0_i32_0 = arith.constant 0 : i32
    %c0_i32_1 = arith.constant 0 : i32
    return %arg0, %c0_i32, %c0_i32_0 : i32, i32, i32
  }
  func.func @transform_1(%arg0: i32) -> (i32, i32) {
    %c0_i32 = arith.constant 0 : i32
    %c0_i32_0 = arith.constant 0 : i32
    %c0_i32_1 = arith.constant 0 : i32
    return %c0_i32, %c0_i32_0 : i32, i32
  }
  func.func @transform_2(%arg0: i32) -> (i32, i32) {
    %c0_i32 = arith.constant 0 : i32
    %c0_i32_0 = arith.constant 0 : i32
    %c0_i32_1 = arith.constant 0 : i32
    return %c0_i32, %c0_i32_0 : i32, i32
  }
  func.func @transform_3(%arg0: i32) -> (i32, i32, i32) {
    %c0_i32 = arith.constant 0 : i32
    %c0_i32_0 = arith.constant 0 : i32
    %c0_i32_1 = arith.constant 0 : i32
    return %arg0, %c0_i32, %c0_i32_0 : i32, i32, i32
  }
}

</mosaic_0001>

<bundles_post_ra>
// kernel: se_layer.1
= control target key start
LH: loop header
LB: loop body
LE: loop exit
PB: predicated region body
PF: predicated region fallthrough
CT: control target
= control target key end

     0   :  { %s676_s12 = smov 0   ;;  %s821_s0 = inlined_call_operand.vmem [shape: f32[2,64,256], index: 0, kind: input, shape index: {}]   ;;  %s822_s1 = inlined_call_operand.vmem [shape: f32[64,8], index: 1, kind: input, shape index: {}]   ;;  %s823_s2 = inlined_call_operand.vmem [shape: f32[8,64], index: 2, kind: input, shape index: {}]   ;;  %s824_s3 = inlined_call_operand.vmem [shape: f32[2,64,256], index: 3, kind: output, shape index: {}]  }
   0x1 LB: > { %s567_s13 = sadd.s32 4294967295, %s651_s12   ;;  %p571_p0 = scmp.ge.s32.totalorder %s651_s12, 1  ;;  %s651_s12 = sphi %s676_s12, %s13_s12  }
   0x2   : > { %p137_p1 = scmp.lt.s32.totalorder %s651_s12, 3 }
   0x4   : > { %p138_p2 = pnand %p571_p0, %p137_p1 }
   0x5   : > { %p161_p3 = scmp.lt.s32.totalorder (!%p138_p2), %s567_s13, 1  ;;  %v219_v24 = vld [vmem:[%s822_s1] sm:$0xff] (!%p138_p2)  ;;  %v220_v25 = vld [vmem:[%s822_s1 + $0x8] sm:$0xff] (!%p138_p2)  ;;  %v653_v27 = vmov (!%p138_p2), 0.0|0.0   ;;  %v221_v28 = vld [vmem:[%s822_s1 + $0x10] sm:$0xff] (!%p138_p2)  ;;  %vm654_vm0 = vmmov (!%p138_p2), 0   ;;  %v235_v38 = vlaneseq (!%p138_p2) }
   0x6   : > { %141 = sbr.rel (%p138_p2) target bundleno = 767 (0x2ff), region = 32  ;;  %v619_v26 = vpack.c.bf16 (!%p138_p2), %v220_v25, %v219_v24  ;;  %618 = vmatprep.subr.bf16.mxu0 (!%p138_p2), %v653_v27  ;;  %v222_v29 = vld [vmem:[%s822_s1 + $0x18] sm:$0xff] (!%p138_p2)  ;;  %v223_v31 = vld [vmem:[%s822_s1 + $0x20] sm:$0xff] (!%p138_p2)  ;;  %v224_v32 = vld [vmem:[%s822_s1 + $0x28] sm:$0xff] (!%p138_p2)  ;;  %v655_v37 = vmov (!%p138_p2), 0.0   ;;  %vm246_vm1 = vcmask (!%p138_p2), 130112  }
   0x7   : > { %v622_v30 = vpack.c.bf16 (!%p138_p2), %v222_v29, %v221_v28  ;;  %v625_v33 = vpack.c.bf16 (!%p138_p2), %v224_v32, %v223_v31  ;;  %v225_v34 = vld [vmem:[%s822_s1 + $0x30] sm:$0xff] (!%p138_p2)  ;;  %v226_v35 = vld [vmem:[%s822_s1 + $0x38] sm:$0xff] (!%p138_p2)  ;;  %610 = vmatprep.mubr.msk.f32.mxu0 (!%p138_p2), %vm654_vm0, %v655_v37  ;;  %613 = vmatprep.subr.mxu1 (!%p138_p2), %v655_v37  ;;  %v236_v39 = vand.u32 (!%p138_p2), 127, %v235_v38  ;;  %v764_v40 = vshrl.u32 (!%p138_p2), %v235_v38, 7 }
   0x8   : > { %620 = vmatpush3.bf16.msra.mxu0 (!%p138_p2), %v619_v26  ;;  %v628_v36 = vpack.c.bf16 (!%p138_p2), %v226_v35, %v225_v34  ;;  %615 = vmatprep.mubr.msk.f32.mxu1 (!%p138_p2), %vm654_vm0, %v655_v37  ;;  %vm253_vm2 = vcmask (!%p138_p2), 195712   ;;  %vm260_vm3 = vcmask (!%p138_p2), 261312   ;;  %vm267_vm4 = vcmask (!%p138_p2), 326912  }
   0x9   : > { %621 = vmatprep.subr.bf16.mxu0 (!%p138_p2), %v653_v27  ;;  %v241_v41 = vadd.s32 (!%p138_p2), 4294967288, %v236_v39  ;;  %v248_v43 = vadd.s32 (!%p138_p2), 4294967280, %v236_v39  ;;  %v255_v44 = vadd.s32 (!%p138_p2), 4294967272, %v236_v39  ;;  %v239_v46 = vsub.s32 (!%p138_p2), %v236_v39, %v764_v40 }
   0xa   : > { %v262_v49 = vadd.s32 (!%p138_p2), 4294967264, %v236_v39  ;;  %v269_v54 = vadd.s32 (!%p138_p2), 4294967256, %v236_v39  ;;  %v276_v61 = vadd.s32 (!%p138_p2), 4294967248, %v236_v39  ;;  %vm274_vm5 = vcmask (!%p138_p2), 392512  }
   0xb   : > { %v244_v48 = vsub.s32 (!%p138_p2), %v241_v41, %v764_v40  ;;  %v251_v50 = vsub.s32 (!%p138_p2), %v248_v43, %v764_v40  ;;  %v258_v53 = vsub.s32 (!%p138_p2), %v255_v44, %v764_v40  ;;  %vm281_vm6 = vcmask (!%p138_p2), 458112  }
   0xc   : > { %623 = vmatpush3.bf16.msra.mxu0 (!%p138_p2), %v622_v30  ;;  %v265_v60 = vsub.s32 (!%p138_p2), %v262_v49, %v764_v40  ;;  %v279_v26 = vsub.s32 (!%p138_p2), %v276_v61, %v764_v40  ;;  %vm288_vm7 = vcmask (!%p138_p2), 523712   ;;  %vm290_vm8 = vcmask (!%p138_p2), 523264  }
   0xd   : > { %s826_s13 = smov (!%p161_p3, %s567_s13), 1  ;;  %624 = vmatprep.subr.bf16.mxu0 %v653_v27  ;;  %vm365_vm9 = vcmask 64512   ;;  %v447_v49 = vsub.s32 0, %v764_v40 }
   0xe   : > { %s581_s14 = sshll.u32 %s826_s13, 7 }
   0xf   : > { %s165_s17 = scalar_lea.vmem %s821_s0, %s581_s14  ;;  %s784_s11 = scalar_lea.vmem %s824_s3, %s581_s14 }
  0x10   : > { %v692_v0 = vld [vmem:[%s165_s17] sm:$0xff]  ;;  %v694_v1 = vld [vmem:[%s165_s17 + $0x8] sm:$0xff]  ;;  %v702_v5 = vld [vmem:[%s165_s17 + $0x10] sm:$0xff]  ;;  %626 = vmatpush3.bf16.msra.mxu0 %v625_v33 }
  0x11   : > { %v696_v2 = vld [vmem:[%s165_s17 + $0x20] sm:$0xff]  ;;  %v187_v3 = vadd.f32 %v694_v1, %v692_v0  ;;  %v700_v4 = vld [vmem:[%s165_s17 + $0x28] sm:$0xff]  ;;  %v704_v6 = vld [vmem:[%s165_s17 + $0x18] sm:$0xff]  ;;  %627 = vmatprep.subr.bf16.mxu0 %v653_v27 }
  0x12   : > { %v193_v7 = vadd.f32 %v700_v4, %v696_v2  ;;  %v708_v8 = vld [vmem:[%s165_s17 + $0x30] sm:$0xff]  ;;  %v710_v9 = vld [vmem:[%s165_s17 + $0x38] sm:$0xff]  ;;  %v190_v10 = vadd.f32 %v704_v6, %v702_v5  ;;  %v716_v12 = vld [vmem:[%s165_s17 + $0x40] sm:$0xff] }
  0x13   : > { %188 = vadd.xlane.f32.xlu0 %v187_v3  ;;  %v196_v11 = vadd.f32 %v710_v9, %v708_v8  ;;  %v718_v13 = vld [vmem:[%s165_s17 + $0x48] sm:$0xff]  ;;  %v720_v14 = vld [vmem:[%s165_s17 + $0x50] sm:$0xff]  ;;  %v722_v15 = vld [vmem:[%s165_s17 + $0x58] sm:$0xff] }
  0x14   : > { %194 = vadd.xlane.f32.xlu1 %v193_v7  ;;  %v199_v16 = vadd.f32 %v718_v13, %v716_v12  ;;  %v202_v17 = vadd.f32 %v722_v15, %v720_v14  ;;  %v728_v18 = vld [vmem:[%s165_s17 + $0x60] sm:$0xff]  ;;  %v730_v19 = vld [vmem:[%s165_s17 + $0x68] sm:$0xff]  ;;  %v732_v20 = vld [vmem:[%s165_s17 + $0x70] sm:$0xff]  ;;  %629 = vmatpush3.bf16.msra.mxu0 %v628_v36  ;;  %v272_v7 = vsub.s32 %v269_v54, %v764_v40 }
  0x15   : > { %v734_v21 = vld [vmem:[%s165_s17 + $0x78] sm:$0xff]  ;;  %v205_v22 = vadd.f32 %v730_v19, %v728_v18 }
  0x16   : > { %v208_v23 = vadd.f32 %v734_v21, %v732_v20 }
  0x17   : > { %191 = vadd.xlane.f32.xlu0 %v190_v10  ;;  %v283_v10 = vadd.s32 4294967240, %v236_v39  ;;  %v364_v39 = vld [vmem:[%s823_s2] sm:$0xff] }
  0x18   : > { %197 = vadd.xlane.f32.xlu1 %v196_v11  ;;  %614 = vmatpush3.msra.mxu1 %v364_v39 }
  0x19   : > { %v286_v29 = vsub.s32 %v283_v10, %v764_v40 }
  0x1b   : > { %200 = vadd.xlane.f32.xlu0 %v199_v16 }
  0x1c   : > { %203 = vadd.xlane.f32.xlu1 %v202_v17 }
  0x1f   : > { %206 = vadd.xlane.f32.xlu0 %v205_v22 }
  0x20   : > { %209 = vadd.xlane.f32.xlu1 %v208_v23 }
  0xa0   : > { %v189_v42 = vpop.xlane.xlu0 %188 }
  0xa1   : > { %v195_v45 = vpop.xlane.xlu1 %194  ;;  %v211_v47 = vmul.f32 0.00390625, %v189_v42 }
  0xa2   : > { %v213_v51 = vmul.f32 0.00390625, %v195_v45 }
  0xa3   : > { %v240_v58 = vrot.slane %v211_v47, %v239_v46 }
  0xa4   : > { %v192_v52 = vpop.xlane.xlu0 %191  ;;  %v252_v62 = vrot.slane %v213_v51, %v251_v50 }
  0xa5   : > { %v212_v55 = vmul.f32 0.00390625, %v192_v52  ;;  %v198_v56 = vpop.xlane.xlu1 %197 }
  0xa6   : > { %v214_v57 = vmul.f32 0.00390625, %v198_v56 }
  0xa7   : > { %v245_v59 = vrot.slane %v212_v55, %v244_v48 }
  0xa8   : > { %v259_v63 = vrot.slane %v214_v57, %v258_v53  ;;  %v201_v3 = vpop.xlane.xlu0 %200 }
  0xa9   : > { %v247_v11 = vsel %vm246_vm1, %v245_v59, %v240_v58  ;;  %v215_v16 = vmul.f32 0.00390625, %v201_v3  ;;  %v204_v17 = vpop.xlane.xlu1 %203 }
  0xaa   : > { %v254_v22 = vsel %vm253_vm2, %v252_v62, %v247_v11  ;;  %v216_v23 = vmul.f32 0.00390625, %v204_v17 }
  0xab   : > { %v261_v24 = vsel %vm260_vm3, %v259_v63, %v254_v22  ;;  %v266_v25 = vrot.slane %v215_v16, %v265_v60 }
  0xac   : > { %v273_v27 = vrot.slane %v216_v23, %v272_v7  ;;  %v207_v28 = vpop.xlane.xlu0 %206 }
  0xad   : > { %v268_v30 = vsel %vm267_vm4, %v266_v25, %v261_v24  ;;  %v217_v31 = vmul.f32 0.00390625, %v207_v28  ;;  %v210_v32 = vpop.xlane.xlu1 %209 }
  0xae   : > { %v218_v33 = vmul.f32 0.00390625, %v210_v32  ;;  %v275_v35 = vsel %vm274_vm5, %v273_v27, %v268_v30 }
  0xaf   : > { %v280_v34 = vrot.slane %v217_v31, %v279_v26 }
  0xb0   : > { %v287_v36 = vrot.slane %v218_v33, %v286_v29 }
  0xb1   : > { %v282_v37 = vsel %vm281_vm6, %v280_v34, %v275_v35 }
  0xb2   : > { %v289_v38 = vsel %vm288_vm7, %v287_v36, %v282_v37 }
  0xb3   : > { %611 = vmatmul.mubr.msk.f32.vlgmr.msra.gmra.mrb[0].mxu0 %vm290_vm8, %v289_v38 }
 0x186   : > { %v359_v41 = vpop.f32.mrb[0].mxu0 }
 0x187   : > { %v363_v42 = vmax.f32 %v359_v41, 0.0  ;;  %v612_v43 = vpop.f32.mrb[1].mxu0 }
 0x189   : > { %616 = vmatmul.mubr.msk.f32.vlgmr.msra.gmra.mrb[0].mxu1 %vm365_vm9, %v363_v42 }
 0x25c   : > { %v435_v44 = vpop.f32.mrb[0].mxu1 }
 0x25d   : > { %v578_v45 = vmul.f32 -1.442695, %v435_v44  ;;  %v617_v46 = vpop.f32.mrb[1].mxu1 }
 0x25f   : > { %641 = vpow2.f32 %v578_v45 }
 0x269   : > { %v642_v47 = vpop.eup %641 }
 0x26a   : > { %v442_v48 = vadd.f32 1.0, %v642_v47 }
 0x26c   : > { %643 = vrcp.f32 %v442_v48 }
 0x276   : > { %v644_v50 = vpop.eup %643 }
 0x277   : > { %v448_v51 = vrot.slane %v644_v50, %v447_v49 }
 0x279   : > { %454 = vbcast.lane.b32.xlu1 %v448_v51, 264  ;;  %450 = vbcast.lane.b32.xlu0 %v448_v51, 256 }
 0x27d   : > { %458 = vbcast.lane.b32.xlu1 %v448_v51, 272  ;;  %466 = vbcast.lane.b32.xlu0 %v448_v51, 288 }
 0x281   : > { %462 = vbcast.lane.b32.xlu1 %v448_v51, 280  ;;  %474 = vbcast.lane.b32.xlu0 %v448_v51, 304 }
 0x285   : > { %470 = vbcast.lane.b32.xlu1 %v448_v51, 296 }
 0x289   : > { %478 = vbcast.lane.b32.xlu1 %v448_v51, 312 }
 0x2eb   : > { %v455_v40 = vpop.permute.xlu1 %454  ;;  %v451_v52 = vpop.permute.xlu0 %450 }
 0x2ec   : > { %v482_v53 = vmul.f32 %v455_v40, %v702_v5  ;;  %v483_v54 = vmul.f32 %v455_v40, %v704_v6  ;;  %v480_v55 = vmul.f32 %v451_v52, %v692_v0  ;;  %v481_v56 = vmul.f32 %v451_v52, %v694_v1 }
 0x2ee   : > { %498 = vst [vmem:[%s784_s11 + $0x10] sm:$0xff] %v482_v53  ;;  %499 = vst [vmem:[%s784_s11 + $0x18] sm:$0xff] %v483_v54 }
 0x2ef   : > { %496 = vst [vmem:[%s784_s11] sm:$0xff] %v480_v55  ;;  %497 = vst [vmem:[%s784_s11 + $0x8] sm:$0xff] %v481_v56  ;;  %v459_v57 = vpop.permute.xlu1 %458  ;;  %v467_v58 = vpop.permute.xlu0 %466 }
 0x2f0   : > { %v484_v59 = vmul.f32 %v459_v57, %v696_v2  ;;  %v485_v5 = vmul.f32 %v459_v57, %v700_v4  ;;  %v488_v6 = vmul.f32 %v467_v58, %v716_v12  ;;  %v489_v0 = vmul.f32 %v467_v58, %v718_v13 }
 0x2f2   : > { %500 = vst [vmem:[%s784_s11 + $0x20] sm:$0xff] %v484_v59  ;;  %501 = vst [vmem:[%s784_s11 + $0x28] sm:$0xff] %v485_v5 }
 0x2f3   : > { %504 = vst [vmem:[%s784_s11 + $0x40] sm:$0xff] %v488_v6  ;;  %505 = vst [vmem:[%s784_s11 + $0x48] sm:$0xff] %v489_v0  ;;  %v463_v1 = vpop.permute.xlu1 %462  ;;  %v475_v60 = vpop.permute.xlu0 %474 }
 0x2f4   : > { %v486_v61 = vmul.f32 %v463_v1, %v708_v8  ;;  %v487_v2 = vmul.f32 %v463_v1, %v710_v9  ;;  %v492_v4 = vmul.f32 %v475_v60, %v728_v18  ;;  %v493_v12 = vmul.f32 %v475_v60, %v730_v19 }
 0x2f6   : > { %502 = vst [vmem:[%s784_s11 + $0x30] sm:$0xff] %v486_v61  ;;  %503 = vst [vmem:[%s784_s11 + $0x38] sm:$0xff] %v487_v2 }
 0x2f7   : > { %508 = vst [vmem:[%s784_s11 + $0x60] sm:$0xff] %v492_v4  ;;  %509 = vst [vmem:[%s784_s11 + $0x68] sm:$0xff] %v493_v12  ;;  %v471_v13 = vpop.permute.xlu1 %470 }
 0x2f8   : > { %v490_v62 = vmul.f32 %v471_v13, %v720_v14  ;;  %v491_v63 = vmul.f32 %v471_v13, %v722_v15 }
 0x2fa   : > { %506 = vst [vmem:[%s784_s11 + $0x50] sm:$0xff] %v490_v62  ;;  %507 = vst [vmem:[%s784_s11 + $0x58] sm:$0xff] %v491_v63 }
 0x2fb   : > { %v479_v8 = vpop.permute.xlu1 %478 }
 0x2fc   : > { %v494_v3 = vmul.f32 %v479_v8, %v732_v20  ;;  %v495_v9 = vmul.f32 %v479_v8, %v734_v21 }
 0x2fe   : > { %510 = vst [vmem:[%s784_s11 + $0x70] sm:$0xff] %v494_v3  ;;  %511 = vst [vmem:[%s784_s11 + $0x78] sm:$0xff] %v495_v9 }
 0x2ff PF: > { %s13_s12 = sadd.s32 1, %s651_s12  }
 0x300   : > { %p10_p4 = scmp.ge.s32.totalorder %s13_s12, 4  }
 0x302   :  { %12 = sbr.rel (!%p10_p4) target bundleno = 1 (0x1), region = 62 }

</bundles_post_ra>
